<compile_context>
chip_gen: v6e
topology: v6e:2x2x1
jax: 0.10.0
libtpu: 0.0.40
codegen_flags: <defaults>
</compile_context>

<pallas_src>
import jax
import jax.numpy as jnp
from jax.experimental import pallas as pl
from jax.experimental.pallas import tpu as pltpu


def _cdiv(a: int, b: int) -> int:
    return -(-a // b)


def _round_down(x: int, m: int) -> int:
    return (x // m) * m


def _round_up(x: int, m: int) -> int:
    return _cdiv(x, m) * m


def _vmem_capacity_bytes() -> int:
    """Per-TensorCore VMEM capacity; conservative fallback is v7x's 64 MiB."""
    try:
        info = pltpu.get_tpu_info()
        cap = getattr(info, "vmem_capacity_bytes", None)
        if cap:
            return int(cap)
    except Exception:
        pass
    return 64 * 1024 * 1024


def _mag_minmax_kernel(re_ref, im_ref, out_re_ref, out_im_ref):
    # Upcast to f32 for all internal math (no-op for f32 inputs). The kernel is
    # HBM-bound, so the extra converts ride in spare VALU slots.
    re = re_ref[...].astype(jnp.float32)                 # (C, T)
    im = im_ref[...].astype(jnp.float32)                 # (C, T)

    # Squared magnitude; sqrt is monotone, so min/max commute with it exactly.
    msq = re * re + im * im

    mn = jnp.sqrt(jnp.min(msq, axis=0, keepdims=True))   # (1, T)
    mx = jnp.sqrt(jnp.max(msq, axis=0, keepdims=True))   # (1, T)

    # Reciprocal on the reduced tile only (EUP slot, not a per-element divide).
    # mx == mn reproduces the reference's divide-by-zero -> inf/nan classes.
    inv = pl.reciprocal(mx - mn, approx=False)            # (1, T)

    # x_min only touches the real part; phase stays unchanged.
    out_re_ref[...] = ((re - mn) * inv).astype(out_re_ref.dtype)
    out_im_ref[...] = (im * inv).astype(out_im_ref.dtype)


def _choose_spatial_tile(hw: int, b: int, c: int, dtype, tile_budget: int,
                         min_steps: int = 4) -> int:
    """Pick the lane-axis tile T.

    Constraints:
      * T is a multiple of 128 (or the full extent `hw`).
      * Double-buffered working set (2 in + 2 out blocks, sublane-padded C,
        plus f32 intermediates) stays within `tile_budget`.
      * Total grid steps B * cdiv(HW, T) >= min_steps (preferably even) so the
        pipeline has work and both v7x TensorCores are occupied.
    """
    itemsize = jnp.dtype(dtype).itemsize
    sublane = 8 * max(1, 4 // itemsize)           # 8 for f32, 16 for bf16
    padded_c = _round_up(c, sublane)

    # 2 inputs + 2 outputs, double buffered = 8 pipeline buffers in the input
    # dtype, plus ~3 f32-sized intermediates (re, im, msq) for the upcast path.
    bytes_per_lane = padded_c * (8 * itemsize + 3 * 4)
    max_t = max(128, _round_down(tile_budget // bytes_per_lane, 128))

    if hw <= 128:
        return hw                                  # single full-extent tile

    t = min(max_t, _round_up(hw, 128))

    # Occupancy: ensure at least `min_steps` total grid steps when possible.
    tiles = _cdiv(hw, t)
    if b * tiles < min_steps:
        needed = _cdiv(min_steps, b)
        t = max(128, min(t, _round_down(_cdiv(hw, needed), 128)))
        tiles = _cdiv(hw, t)

    # Prefer an even total step count (v7x has 2 TensorCores per chip).
    if (b * tiles) % 2 == 1 and t > 128:
        t2 = max(128, _round_down(_cdiv(hw, tiles + 1), 128))
        if t2 < t and (b * _cdiv(hw, t2)) % 2 == 0:
            t = t2

    if t >= hw:
        return hw                                  # full extent is always legal
    return t


def mag_minmax_norm(z_real: jax.Array, z_imag: jax.Array):
    """Pallas implementation of MagMinMaxNorm with dim=1 (channel axis).

    Args:
        z_real, z_imag: float arrays of shape (B, C, H, W).

    Returns:
        (out_real, out_imag) with the same shape / dtype.
    """
    assert z_real.shape == z_imag.shape
    assert z_real.dtype == z_imag.dtype
    B, C, H, W = z_real.shape
    dtype = z_real.dtype
    itemsize = jnp.dtype(dtype).itemsize

    HW = H * W
    # Lane-dense layout: put H*W on the lane axis.
    re_flat = z_real.reshape(B, C, HW)
    im_flat = z_imag.reshape(B, C, HW)

    # Per-generation VMEM budgets: ~35% for the pipelined working set, ~70%
    # hard limit (leaves headroom for compiler scratch; tight-but-safe on v7x's
    # 64 MiB, lets v5e/v6e (128 MiB) run larger tiles).
    vmem_cap = _vmem_capacity_bytes()
    tile_budget = int(vmem_cap * 0.35)
    vmem_limit = int(vmem_cap * 0.70)

    T = _choose_spatial_tile(HW, B, C, dtype, tile_budget)
    num_tiles = _cdiv(HW, T)

    # Kernel sees (C, T); batch dim is squeezed away. Ragged last spatial tile
    # (when T does not divide HW) is masked by Pallas; math is per-lane so
    # padded lanes are harmless.
    block = (pl.Squeezed(), C, T)
    idx = lambda b, s: (b, 0, s)

    out_shape = (
        jax.ShapeDtypeStruct((B, C, HW), dtype),
        jax.ShapeDtypeStruct((B, C, HW), dtype),
    )

    n_elem = B * C * HW
    cost = pl.CostEstimate(
        flops=8 * n_elem,                      # msq, reductions, sub, 2 muls
        transcendentals=3 * B * HW,            # 2 sqrt + 1 reciprocal per lane
        bytes_accessed=4 * n_elem * itemsize,  # 2 reads + 2 writes
    )

    out_re, out_im = pl.pallas_call(
        _mag_minmax_kernel,
        out_shape=out_shape,
        grid_spec=pltpu.PrefetchScalarGridSpec(
            num_scalar_prefetch=0,
            grid=(B, num_tiles),
            in_specs=[
                pl.BlockSpec(block, idx),
                pl.BlockSpec(block, idx),
            ],
            out_specs=[
                pl.BlockSpec(block, idx),
                pl.BlockSpec(block, idx),
            ],
        ),
        compiler_params=pltpu.CompilerParams(
            dimension_semantics=("parallel", "parallel"),
            vmem_limit_bytes=vmem_limit,
        ),
        cost_estimate=cost,
    )(re_flat, im_flat)

    return out_re.reshape(B, C, H, W), out_im.reshape(B, C, H, W)


def _reference(z_real, z_imag):
    """Pure-JAX reference mirroring the PyTorch module (dim=1)."""
    mag = jnp.sqrt(z_real * z_real + z_imag * z_imag)
    mn = jnp.min(mag, axis=1, keepdims=True)
    mx = jnp.max(mag, axis=1, keepdims=True)
    denom = mx - mn
    return (z_real - mn) / denom, z_imag / denom


if __name__ == "__main__":
    key = jax.random.PRNGKey(0)
    k_re, k_im = jax.random.split(key)

    B, C, H, W = 2, 4, 16, 16
    z_real = jax.random.normal(k_re, (B, C, H, W), dtype=jnp.float32)
    z_imag = jax.random.normal(k_im, (B, C, H, W), dtype=jnp.float32)

    out_re, out_im = mag_minmax_norm(z_real, z_imag)
    jax.block_until_ready((out_re, out_im))

    ref_re, ref_im = _reference(z_real, z_imag)
    assert jnp.allclose(out_re, ref_re, atol=1e-5, rtol=1e-5)
    assert jnp.allclose(out_im, ref_im, atol=1e-5, rtol=1e-5)

    print("KERNEL_OK")
</pallas_src>

<mosaic_0001>
module attributes {stable_mosaic.version = 11 : i64} {
  func.func @_mag_minmax_kernel(%arg0: i32, %arg1: i32, %arg2: memref<1x4x128xf32, #tpu.memory_space<vmem>>, %arg3: memref<1x4x128xf32, #tpu.memory_space<vmem>>, %arg4: memref<1x4x128xf32, #tpu.memory_space<vmem>>, %arg5: memref<1x4x128xf32, #tpu.memory_space<vmem>>) attributes {dimension_semantics = [#tpu.dimension_semantics<parallel>, #tpu.dimension_semantics<parallel>], iteration_bounds = array<i64: 2, 2>, scalar_prefetch = 0 : i64, scratch_operands = 0 : i64, tpu.core_type = #tpu.core_type<tc>, window_params = [{transform_indices = @transform_0, window_bounds = array<i64: 1, 4, 128>}, {transform_indices = @transform_1, window_bounds = array<i64: 1, 4, 128>}, {transform_indices = @transform_2, window_bounds = array<i64: 1, 4, 128>}, {transform_indices = @transform_3, window_bounds = array<i64: 1, 4, 128>}]} {
    %c0 = arith.constant 0 : index
    %c0_0 = arith.constant 0 : index
    %c0_1 = arith.constant 0 : index
    %0 = vector.load %arg2[%c0, %c0_0, %c0_1] : memref<1x4x128xf32, #tpu.memory_space<vmem>>, vector<1x4x128xf32>
    %1 = vector.shape_cast %0 : vector<1x4x128xf32> to vector<4x128xf32>
    %c0_2 = arith.constant 0 : index
    %c0_3 = arith.constant 0 : index
    %c0_4 = arith.constant 0 : index
    %2 = vector.load %arg3[%c0_2, %c0_3, %c0_4] : memref<1x4x128xf32, #tpu.memory_space<vmem>>, vector<1x4x128xf32>
    %3 = vector.shape_cast %2 : vector<1x4x128xf32> to vector<4x128xf32>
    %4 = arith.mulf %1, %1 : vector<4x128xf32>
    %5 = arith.mulf %3, %3 : vector<4x128xf32>
    %6 = arith.addf %4, %5 : vector<4x128xf32>
    %cst = arith.constant dense<0x7F800000> : vector<128xf32>
    %7 = vector.multi_reduction <minimumf>, %6, %cst [0] : vector<4x128xf32> to vector<128xf32>
    %8 = vector.shape_cast %7 : vector<128xf32> to vector<1x128xf32>
    %9 = math.sqrt %8 : vector<1x128xf32>
    %cst_5 = arith.constant dense<0xFF800000> : vector<128xf32>
    %10 = vector.multi_reduction <maximumf>, %6, %cst_5 [0] : vector<4x128xf32> to vector<128xf32>
    %11 = vector.shape_cast %10 : vector<128xf32> to vector<1x128xf32>
    %12 = math.sqrt %11 : vector<1x128xf32>
    %13 = arith.subf %12, %9 : vector<1x128xf32>
    %14 = tpu.reciprocal %13 : vector<1x128xf32> -> vector<1x128xf32>
    %15 = vector.broadcast %9 : vector<1x128xf32> to vector<4x128xf32>
    %16 = arith.subf %1, %15 : vector<4x128xf32>
    %17 = vector.broadcast %14 : vector<1x128xf32> to vector<4x128xf32>
    %18 = arith.mulf %16, %17 : vector<4x128xf32>
    %c0_6 = arith.constant 0 : index
    %c0_7 = arith.constant 0 : index
    %c0_8 = arith.constant 0 : index
    %19 = vector.load %arg4[%c0_6, %c0_7, %c0_8] : memref<1x4x128xf32, #tpu.memory_space<vmem>>, vector<1x4x128xf32>
    %20 = vector.shape_cast %19 : vector<1x4x128xf32> to vector<4x128xf32>
    %21 = vector.shape_cast %18 : vector<4x128xf32> to vector<1x4x128xf32>
    tpu.vector_store %arg4[%c0_6, %c0_7, %c0_8], %21 {strides = array<i32>} : memref<1x4x128xf32, #tpu.memory_space<vmem>>, vector<1x4x128xf32>,
    %22 = vector.broadcast %14 : vector<1x128xf32> to vector<4x128xf32>
    %23 = arith.mulf %3, %22 : vector<4x128xf32>
    %c0_9 = arith.constant 0 : index
    %c0_10 = arith.constant 0 : index
    %c0_11 = arith.constant 0 : index
    %24 = vector.load %arg5[%c0_9, %c0_10, %c0_11] : memref<1x4x128xf32, #tpu.memory_space<vmem>>, vector<1x4x128xf32>
    %25 = vector.shape_cast %24 : vector<1x4x128xf32> to vector<4x128xf32>
    %26 = vector.shape_cast %23 : vector<4x128xf32> to vector<1x4x128xf32>
    tpu.vector_store %arg5[%c0_9, %c0_10, %c0_11], %26 {strides = array<i32>} : memref<1x4x128xf32, #tpu.memory_space<vmem>>, vector<1x4x128xf32>,
    return
  }
  func.func @transform_0(%arg0: i32, %arg1: i32) -> (i32, i32, i32) {
    %c0_i32 = arith.constant 0 : i32
    %c0_i32_0 = arith.constant 0 : i32
    return %arg0, %c0_i32, %arg1 : i32, i32, i32
  }
  func.func @transform_1(%arg0: i32, %arg1: i32) -> (i32, i32, i32) {
    %c0_i32 = arith.constant 0 : i32
    %c0_i32_0 = arith.constant 0 : i32
    return %arg0, %c0_i32, %arg1 : i32, i32, i32
  }
  func.func @transform_2(%arg0: i32, %arg1: i32) -> (i32, i32, i32) {
    %c0_i32 = arith.constant 0 : i32
    %c0_i32_0 = arith.constant 0 : i32
    return %arg0, %c0_i32, %arg1 : i32, i32, i32
  }
  func.func @transform_3(%arg0: i32, %arg1: i32) -> (i32, i32, i32) {
    %c0_i32 = arith.constant 0 : i32
    %c0_i32_0 = arith.constant 0 : i32
    return %arg0, %c0_i32, %arg1 : i32, i32, i32
  }
}

</mosaic_0001>

<bundles_post_ra>
// kernel: tpu_custom_call.1
= control target key start
LH: loop header
LB: loop body
LE: loop exit
PB: predicated region body
PF: predicated region fallthrough
CT: control target
= control target key end

     0   :  { %s1041_s0 = inlined_call_operand.hbm [shape: f32[2,4,256], index: 0, kind: input, shape index: {}]   ;;  %s1042_s1 = inlined_call_operand.hbm [shape: f32[2,4,256], index: 1, kind: input, shape index: {}]   ;;  %s1043_s2 = inlined_call_operand.hbm [shape: f32[2,4,256], index: 2, kind: output, shape index: {0}]   ;;  %s1044_s3 = inlined_call_operand.hbm [shape: f32[2,4,256], index: 3, kind: output, shape index: {1}]  }
   0x1   :  { %1046 = sst [smem:[#allocation15_spill]] %s1041_s0 }
   0x2   :  { %9 = vsyncpa [#allocation3], 0 }
   0x3   :  { %11 = vsyncpa [#allocation3 + $0x1], 0 }
   0x4   :  { %12 = vsyncpa [#allocation6], 0 }
   0x5   :  { %14 = vsyncpa [#allocation6 + $0x1], 0 }
   0x6   :  { %15 = vsyncpa [#allocation4], 0 }
   0x7   :  { %17 = vsyncpa [#allocation4 + $0x1], 0 }
   0x8   :  { %18 = vsyncpa [#allocation9], 0 }
   0x9   :  { %20 = vsyncpa [#allocation9 + $0x1], 0  ;;  %s808_s12 = smov 0   ;;  %s810_s13 = smov 0  }
   0xa   :  { %s812_s14 = smov 0   ;;  %s814_s15 = smov 0  }
   0xb   :  { %s816_s16 = smov 0   ;;  %s818_s17 = smov 0  }
   0xc   :  { %s820_s18 = smov 0   ;;  %s822_s19 = smov 0  }
   0xd LB: > { %s479_s20 = sadd.s32 4294967295, %s782_s19   ;;  %s480_s21 = sadd.s32 4294967294, %s782_s19   ;;  %s782_s19 = sphi %s822_s19, %s26_s19   ;;  %s778_s18 = sphi %s820_s18, %s1062_s18   ;;  %s774_s17 = sphi %s818_s17, %s1061_s17   ;;  %s770_s16 = sphi %s816_s16, %s1060_s16   ;;  %s766_s15 = sphi %s814_s15, %s1059_s15   ;;  %s762_s14 = sphi %s812_s14, %s1058_s14   ;;  %s758_s13 = sphi %s810_s13, %s1057_s13   ;;  %s754_s12 = sphi %s808_s12, %s1056_s12  }
   0xe   : > { %s35_s22 = sadd.s32 1, %s774_s17  ;;  %s38_s23 = sadd.s32 1, %s778_s18 }
   0xf   : > { %p36_p0 = scmp.ge.s32.totalorder %s35_s22, 2  ;;  %s47_s24 = sadd.s32 1, %s762_s14 }
  0x10   : > { %p54_p1 = scmp.ne.s32.totalorder %s762_s14, %s758_s13  ;;  %p55_p2 = scmp.eq.s32.totalorder %s782_s19, 0 }
  0x11   : > { %s1064_s22 = smov (%p36_p0, %s35_s22), 0  ;;  %s1066_s23 = smov (!%p36_p0, %s38_s23), %s778_s18 }
  0x12   : > { %s43_s25 = ssub.s32 %s774_s17, %s1064_s22  ;;  %p861_p3 = por %p55_p2, %p54_p1 }
  0x13   : > { %p40_p4 = scmp.ge.s32.totalorder %s1066_s23, 2  ;;  %p60_p5 = scmp.ne.s32.totalorder %s758_s13, %s754_s12 }
  0x14   : > { %p61_p6 = scmp.eq.s32.totalorder %s479_s20, 0  ;;  %p114_p7 = scmp.eq.s32.totalorder %s479_s20, 3 }
  0x15   : > { %s1068_s23 = smov (%p40_p4, %s1066_s23), 0  ;;  %p120_p10 = scmp.eq.s32.totalorder %s480_s21, 3 }
  0x16   : > { %1048 = sst [smem:[#allocation14_spill]] %s1068_s23  ;;  %p869_p8 = por %p61_p6, %p60_p5 }
  0x17   : > { %p873_p9 = por %p114_p7, %p54_p1  ;;  %s42_s29 = ssub.s32 %s778_s18, %s1068_s23 }
  0x18   : > { %s44_s30 = sor.u32 %s43_s25, %s42_s29  ;;  %p879_p12 = por %p120_p10, %p60_p5 }
  0x19   : > { %p45_p11 = scmp.eq.s32.totalorder %s44_s30, 0  ;;  %p524_p13 = scmp.lt.s32.totalorder %s782_s19, 4 }
  0x1a   : > { %s885_s5 = sand.u32 1, %s762_s14   ;;  %s484_s8 = sshll.u32 %s778_s18, 1 }
  0x1b   : > { %s888_s6 = scalar_select %p45_p11, %s762_s14, %s47_s24  }
  0x1c   : > { %s483_s7 = sshll.u32 %s885_s5, 2  ;;  %s177_s9 = sadd.s32 %s774_s17, %s484_s8 }
  0x1d   : > { %s172_s10 = scalar_lea.vmem [#allocation2], %s483_s7  ;;  %s485_s20 = sshll.u32 %s177_s9, 6 }
  0x1e   : > { %s181_s11 = sshll.u32 %s172_s10, 4  ;;  %s1052_s0 = sld [smem:[#allocation15_spill]]  ;;  %s182_s11 = int_to_ptr.vmem [resolvable:$true] %s181_s11 }
  0x1f   : > { %p900_p0 = pnand %p524_p13, %p861_p3  ;;  %p489_p1 = scmp.ge.s32.totalorder %s782_s19, 1 }
  0x20   : > { %p206_p2 = scmp.lt.s32.totalorder %s782_s19, 5  ;;  %s169_s24 = scalar_lea.sflag [#allocation3], %s885_s5 }
  0x21   : > { %p598_p4 = pneg %p900_p0  ;;  %s609_s8 = scalar_lea.vmem %s182_s11, 64 }
  0x22   : > { %p610_p5 = scmp.ne.s32.totalorder %s182_s11, %s609_s8  ;;  %s784_s9 = smov [#allocation2]  }
  0x23   : > { %s614_s10 = sshll.u32 %s784_s9, 4  ;;  %s615_s10 = int_to_ptr.vmem [resolvable:$false] %s614_s10 }
  0x24   : > { %s179_s29 = scalar_lea.hbm %s1052_s0, %s485_s20  ;;  %p612_p6 = pnand %p610_p5, %p598_p4 }
  0x25   : > { %s616_s26 = scalar_lea.vmem %s615_s10, 128  ;;  %p617_p3 = scmp.lt.s32.totalorder %s182_s11, %s615_s10 }
  0x26   : > { %p613_p7 = pneg %p612_p6  ;;  %p618_p10 = scmp.lt.s32.totalorder %s616_s26, %s609_s8 }
  0x28   : > { %p619_p11 = por %p618_p10, %p617_p3 }
  0x2a   : > { %p620_p13 = pnand %p619_p11, %p613_p7 }
  0x2c   : > { %623 = shalt.err (!%p620_p13)
}
  0x2d   : > { %513 = dma.hbm_to_vmem [thread:$0]  (!%p900_p0), %s179_s29, 64, %s182_s11, %s169_s24  }
  0x2e   : > { %p918_p5 = pnand %p489_p1, %p206_p2  ;;  %s199_s8 = scalar_lea.hbm %s1042_s1, %s485_s20 }
  0x2f   : > { %s192_s10 = scalar_lea.vmem [#allocation5], %s483_s7  ;;  %s189_s0 = scalar_lea.sflag [#allocation6], %s885_s5 }
  0x30   : > { %s201_s26 = sshll.u32 %s192_s10, 4  ;;  %s785_s11 = smov [#allocation5]   ;;  %s202_s26 = int_to_ptr.vmem [resolvable:$true] %s201_s26 }
  0x31   : > { %s637_s23 = scalar_lea.vmem %s202_s26, 64  ;;  %s642_s29 = sshll.u32 %s785_s11, 4  ;;  %s643_s29 = int_to_ptr.vmem [resolvable:$false] %s642_s29 }
  0x32   : > { %p638_p6 = scmp.ne.s32.totalorder %s202_s26, %s637_s23  ;;  %s644_s24 = scalar_lea.vmem %s643_s29, 128 }
  0x33   : > { %p645_p1 = scmp.lt.s32.totalorder %s202_s26, %s643_s29  ;;  %p646_p2 = scmp.lt.s32.totalorder %s644_s24, %s637_s23 }
  0x34   : > { %p640_p7 = pnand %p638_p6, %p598_p4 }
  0x35   : > { %p647_p10 = por %p646_p2, %p645_p1 }
  0x36   : > { %p641_p3 = pneg %p640_p7 }
  0x38   : > { %p648_p11 = pnand %p647_p10, %p641_p3 }
  0x3a   : > { %651 = shalt.err (!%p648_p11)
}
  0x3b   : > { %516 = dma.hbm_to_vmem [thread:$0]  (!%p900_p0), %s199_s8, 64, %s202_s26, %s189_s0  }
  0x3c   : > { %210 = sbr.rel (%p918_p5) target bundleno = 158 (0x9e), region = 28  ;;  %s936_s5 = sand.u32 (!%p918_p5), 1, %s758_s13  }
  0x3d   : > { %s939_s7 = sshll.u32 (!%p918_p5), %s936_s5, 2  ;;  %s213_s20 = scalar_lea.sflag (!%p918_p5), [#allocation3], %s936_s5 }
  0x3e   : > { %s216_s23 = scalar_lea.vmem (!%p918_p5), [#allocation2], %s939_s7 }
  0x41   : > { %737 = dma.done.wait (%p869_p8), %s213_s20, 64  }
  0x42   : > { %739 = vsyncadd (%p869_p8), %s213_s20, 4294967232  ;;  %s222_s0 = scalar_lea.sflag [#allocation6], %s936_s5  ;;  %s225_s30 = scalar_lea.vmem [#allocation5], %s939_s7 }
  0x43   : > { %741 = dma.done.wait (%p869_p8), %s222_s0, 64  }
  0x44   : > { %743 = vsyncadd (%p869_p8), %s222_s0, 4294967232  ;;  %v258_v0 = vld [vmem:[%s216_s23] sm:$0xf]  ;;  %v259_v1 = vld [vmem:[%s225_s30] sm:$0xf]  ;;  %vm263_vm0 = vcmask 1043456  }
  0x45   : > { %v260_v2 = vmul.f32 %v258_v0, %v258_v0  ;;  %v261_v3 = vmul.f32 %v259_v1, %v259_v1  ;;  %s496_s27 = sshll.u32 %s770_s16, 1  ;;  %s250_s25 = scalar_lea.vmem [#allocation7], %s939_s7 }
  0x46   : > { %s316_s21 = sadd.s32 %s766_s15, %s496_s27  ;;  %s320_s9 = sshll.u32 %s250_s25, 4  ;;  %s957_s9 = int_to_ptr.vmem [resolvable:$true] %s320_s9 }
  0x47   : > { %v262_v4 = vadd.f32 %v261_v3, %v260_v2  ;;  %s257_s8 = scalar_lea.vmem [#allocation8], %s939_s7  ;;  %s497_s26 = sshll.u32 %s316_s21, 6 }
  0x48   : > { %s335_s10 = sshll.u32 %s257_s8, 4  ;;  %s964_s11 = scalar_lea.hbm %s1043_s2, %s497_s26  ;;  %s959_s10 = int_to_ptr.vmem [resolvable:$true] %s335_s10 }
  0x49   : > { %v264_v5 = vsel %vm263_vm0, %v262_v4, inf  ;;  %v278_v6 = vsel %vm263_vm0, %v262_v4, -inf  ;;  %s969_s7 = scalar_lea.hbm %s1044_s3, %s497_s26  ;;  %s300_s20 = scalar_lea.sflag [#allocation4], %s936_s5 }
  0x4a   : > { %v265_v7 = vrot.slane %v264_v5, 4  ;;  %v279_v8 = vrot.slane %v278_v6, 4  ;;  %s652_s23 = scalar_lea.vmem %s957_s9, 64  ;;  %s786_s0 = smov [#allocation7]  }
  0x4b   : > { %p653_p8 = scmp.ne.s32.totalorder %s957_s9, %s652_s23  ;;  %s656_s30 = sshll.u32 %s786_s0, 4  ;;  %s657_s30 = int_to_ptr.vmem [resolvable:$false] %s656_s30 }
  0x4c   : > { %v266_v9 = vmin.f32 %v264_v5, %v265_v7  ;;  %v280_v10 = vmax.f32 %v278_v6, %v279_v8  ;;  %s658_s27 = scalar_lea.vmem %s657_s30, 128  ;;  %p659_p13 = scmp.lt.s32.totalorder %s957_s9, %s657_s30 }
  0x4d   : > { %p654_p0 = pnand %p653_p8, %p873_p9  ;;  %p660_p5 = scmp.lt.s32.totalorder %s658_s27, %s652_s23 }
  0x4e   : > { %v267_v11 = vrot.slane %v266_v9, 2  ;;  %v281_v12 = vrot.slane %v280_v10, 2 }
  0x4f   : > { %p655_p4 = pneg %p654_p0  ;;  %p661_p6 = por %p660_p5, %p659_p13 }
  0x50   : > { %v268_v13 = vmin.f32 %v266_v9, %v267_v11  ;;  %v282_v14 = vmax.f32 %v280_v10, %v281_v12 }
  0x51   : > { %p662_p7 = pnand %p661_p6, %p655_p4 }
  0x52   : > { %v269_v15 = vrot.slane %v268_v13, 1  ;;  %v283_v16 = vrot.slane %v282_v14, 1 }
  0x54   : > { %v270_v17 = vmin.f32 %v268_v13, %v269_v15  ;;  %v284_v18 = vmax.f32 %v282_v14, %v283_v16 }
  0x56   : > { %590 = vrsqrt.f32 %v270_v17  ;;  %vm273_vm1 = vcmp.eq.f32.partialorder %v270_v17, inf  ;;  %v276_v20 = vand.u32 2147483648, %v270_v17  ;;  %vm275_vm2 = vcmp.eq.f32.partialorder %v270_v17, 0.0 }
  0x57   : > { %592 = vrsqrt.f32 %v284_v18  ;;  %vm287_vm3 = vcmp.eq.f32.partialorder %v284_v18, inf  ;;  %v290_v23 = vand.u32 2147483648, %v284_v18  ;;  %vm289_vm4 = vcmp.eq.f32.partialorder %v284_v18, 0.0 }
  0x63   : > { %v591_v19 = vpop.eup %590 }
  0x64   : > { %v593_v21 = vpop.eup %592  ;;  %v272_v22 = vmul.f32 %v591_v19, %v270_v17 }
  0x65   : > { %v286_v24 = vmul.f32 %v593_v21, %v284_v18 }
  0x66   : > { %v274_v25 = vsel %vm273_vm1, %v270_v17, %v272_v22 }
  0x67   : > { %v277_v26 = vsel %vm275_vm2, %v276_v20, %v274_v25  ;;  %v288_v27 = vsel %vm287_vm3, %v284_v18, %v286_v24 }
  0x68   : > { %v291_v28 = vsel %vm289_vm4, %v290_v23, %v288_v27  ;;  %v294_v30 = vsub.f32 %v258_v0, %v277_v26 }
  0x69   : > { %v292_v29 = vsub.f32 %v291_v28, %v277_v26 }
  0x6b   : > { %594 = vrcp.f32 %v292_v29 }
  0x78   : > { %v595_v31 = vpop.eup %594 }
  0x79   : > { %v295_v32 = vmul.f32 %v595_v31, %v294_v30  ;;  %v297_v33 = vmul.f32 %v595_v31, %v259_v1 }
  0x7b   : > { %296 = vst [vmem:[%s250_s25] sm:$0xf] %v295_v32  ;;  %298 = vst [vmem:[%s257_s8] sm:$0xf] %v297_v33 }
  0x7c   : > { %665 = shalt.err (!%p662_p7)
}
  0x7d   : > { %s666_s21 = scalar_lea.hbm %s964_s11, 64  ;;  %s670_s26 = scalar_lea.hbm %s1043_s2, 256 }
  0x7e   : > { %p667_p3 = scmp.ne.s32.totalorder %s964_s11, %s666_s21  ;;  %p671_p10 = scmp.lt.s32.totalorder %s964_s11, %s1043_s2 }
  0x7f   : > { %p672_p11 = scmp.lt.s32.totalorder %s670_s26, %s666_s21 }
  0x80   : > { %p668_p1 = pnand %p667_p3, %p873_p9 }
  0x81   : > { %p673_p8 = por %p672_p11, %p671_p10 }
  0x82   : > { %p669_p2 = pneg %p668_p1 }
  0x84   : > { %p674_p0 = pnand %p673_p8, %p669_p2 }
  0x86   : > { %677 = shalt.err (!%p674_p0)
}
  0x87   : > { %506 = dma.vmem_to_hbm [thread:$0]  (%p873_p9), %s957_s9, 64, %s964_s11, %s300_s20  }
  0x88   : > { %s305_s29 = scalar_lea.sflag [#allocation9], %s936_s5  ;;  %s678_s24 = scalar_lea.vmem %s959_s10, 64 }
  0x89   : > { %p679_p4 = scmp.ne.s32.totalorder %s959_s10, %s678_s24  ;;  %s787_s23 = smov [#allocation8]  }
  0x8a   : > { %s682_s0 = sshll.u32 %s787_s23, 4  ;;  %s683_s0 = int_to_ptr.vmem [resolvable:$false] %s682_s0 }
  0x8b   : > { %p680_p13 = pnand %p679_p4, %p873_p9  ;;  %s684_s30 = scalar_lea.vmem %s683_s0, 128 }
  0x8c   : > { %p685_p6 = scmp.lt.s32.totalorder %s959_s10, %s683_s0  ;;  %p686_p7 = scmp.lt.s32.totalorder %s684_s30, %s678_s24 }
  0x8d   : > { %p681_p5 = pneg %p680_p13 }
  0x8e   : > { %p687_p3 = por %p686_p7, %p685_p6 }
  0x90   : > { %p688_p1 = pnand %p687_p3, %p681_p5 }
  0x92   : > { %691 = shalt.err (!%p688_p1)
}
  0x93   : > { %s692_s9 = scalar_lea.hbm %s969_s7, 64  ;;  %s696_s20 = scalar_lea.hbm %s1044_s3, 256 }
  0x94   : > { %p693_p2 = scmp.ne.s32.totalorder %s969_s7, %s692_s9  ;;  %p697_p8 = scmp.lt.s32.totalorder %s969_s7, %s1044_s3 }
  0x95   : > { %p698_p0 = scmp.lt.s32.totalorder %s696_s20, %s692_s9 }
  0x96   : > { %p694_p10 = pnand %p693_p2, %p873_p9 }
  0x97   : > { %p699_p4 = por %p698_p0, %p697_p8 }
  0x98   : > { %p695_p11 = pneg %p694_p10 }
  0x9a   : > { %p700_p13 = pnand %p699_p4, %p695_p11 }
  0x9c   : > { %703 = shalt.err (!%p700_p13)
}
  0x9d   : > { %507 = dma.vmem_to_hbm [thread:$0]  (%p873_p9), %s959_s10, 64, %s969_s7, %s305_s29  }
  0x9e PF: > { %p525_p5 = scmp.ge.s32.totalorder %s782_s19, 2  ;;  %s347_s25 = sand.u32 1, %s754_s12  }
  0x9f   : > { %s348_s8 = scalar_lea.sflag [#allocation4], %s347_s25 }
  0xa0   : > { %p518_p6 = pnand %p525_p5, %p879_p12 }
  0xa2   : > { %p519_p7 = pneg %p518_p6 }
  0xa4   : > { %745 = dma.done.wait (%p519_p7), %s348_s8, 64  }
  0xa5   : > { %747 = vsyncadd (%p519_p7), %s348_s8, 4294967232  ;;  %s357_s26 = scalar_lea.sflag [#allocation9], %s347_s25 }
  0xa6   : > { %749 = dma.done.wait (%p519_p7), %s357_s26, 64  }
  0xa7   : > { %751 = vsyncadd (%p519_p7), %s357_s26, 4294967232  ;;  %s26_s19 = sadd.s32 1, %s782_s19   ;;  %s1055_s28 = sld [smem:[#allocation14_spill]] }
  0xa8   : > { %p23_p3 = scmp.ge.s32.totalorder %s26_s19, 6   ;;  %s1056_s12 = smov %s758_s13 }
  0xa9   : > { %s1057_s13 = smov %s762_s14  ;;  %s1058_s14 = smov %s888_s6 }
  0xaa   : > { %s1059_s15 = smov %s774_s17  ;;  %s1060_s16 = smov %s778_s18 }
  0xab   : > { %s1061_s17 = smov %s1064_s22  ;;  %25 = sbr.rel (!%p23_p3) target bundleno = 13 (0xd), region = 103 }
  0xad   : > { %s1062_s18 = smov %s1055_s28 }
  0xb0   :  { %362 = vsyncpa [#allocation3], 1 }
  0xb1   :  { %364 = vsyncpa [#allocation3 + $0x1], 1 }
  0xb2   :  { %365 = vsyncpa [#allocation6], 1 }
  0xb3   :  { %367 = vsyncpa [#allocation6 + $0x1], 1 }
  0xb4   :  { %368 = vsyncpa [#allocation4], 1 }
  0xb5   :  { %370 = vsyncpa [#allocation4 + $0x1], 1 }
  0xb6   :  { %371 = vsyncpa [#allocation9], 1 }
  0xb7   :  { %373 = vsyncpa [#allocation9 + $0x1], 1 }

</bundles_post_ra>
